<compile_context>
chip_gen: v6e
topology: v6e:2x2x1
jax: 0.10.0
libtpu: 0.0.40
codegen_flags: <defaults>
</compile_context>

<pallas_src>
import math

import jax
import jax.numpy as jnp
from jax.experimental import pallas as pl
from jax.experimental.pallas import tpu as pltpu


def _fused_head_kernel(wmod_ref, bias_ref, x_ref, *o_refs):
    """One grid step = (batch element b, pixel tile p).

    wmod_ref: (1, Cout_total, Cin)  per-sample modulated 1x1 weights (all heads)
    bias_ref: (Cout_total, 1)       concatenated conv biases (broadcast over lanes)
    x_ref:    (1, Cin, TP)          activations, pixels in the 128-lane dim
    o_refs:   one (1, ch_h, TP) ref per head, pixels in the 128-lane dim
    """
    out = (
        jnp.dot(wmod_ref[0], x_ref[0], preferred_element_type=jnp.float32)
        + bias_ref[...]
    )  # (Cout_total, TP)
    off = 0
    for o_ref in o_refs:
        ch = o_ref.shape[1]
        o_ref[0] = out[off:off + ch].astype(o_ref.dtype)
        off += ch


def _pick_pixel_tile(P, cin, cout_total, itemsize,
                     vmem_budget_bytes=20 << 20, max_tp=1 << 16):
    """Largest 128-multiple pixel tile whose double-buffered x + out blocks fit the budget."""
    denom = max(1, 2 * itemsize * (cin + cout_total))   # 2 bufs of x + fused out per pixel
    tp = min(vmem_budget_bytes // denom, max_tp)
    tp = max(128, (tp // 128) * 128)
    if P <= tp:
        return P  # whole pixel row fits the budget; block last dim == full array dim
    return tp     # multiple of 128; ragged last block handled by Pallas (cdiv grid)


def fused_mod_conv1x1(x_bcp, w_mod, bias_col, head_ch):
    """x_bcp: (B, Cin, P); w_mod: (B, Cout_total, Cin); bias_col: (Cout_total, 1).

    Returns one (B, ch_h, P) array per head (same channel order as head_ch).
    """
    B, Cin, P = x_bcp.shape
    Cout = w_mod.shape[1]
    itemsize = jnp.dtype(x_bcp.dtype).itemsize

    tp = _pick_pixel_tile(P, Cin, Cout, itemsize)
    num_pt = pl.cdiv(P, tp)

    # v7x megacore: when B == 1, put the (large) pixel axis first so both
    # TensorCores get grid points; otherwise keep pixels innermost so the
    # per-sample weight block index is constant across the pixel stream
    # (no weight re-DMA).
    if B == 1:
        grid = (num_pt, B)
        wmod_map = lambda p, b: (b, 0, 0)
        bias_map = lambda p, b: (0, 0)
        x_map = lambda p, b: (b, 0, p)
        out_map = lambda p, b: (b, 0, p)
    else:
        grid = (B, num_pt)
        wmod_map = lambda b, p: (b, 0, 0)
        bias_map = lambda b, p: (0, 0)
        x_map = lambda b, p: (b, 0, p)
        out_map = lambda b, p: (b, 0, p)

    # Explicit VMEM limit: double-buffered x + out blocks, weight/bias blocks,
    # plus headroom.  Raises v5e's 16 MiB scoped default; stays well under
    # v7x's 64 MiB physical VMEM.
    est_vmem = (
        2 * itemsize * tp * (Cin + Cout)
        + 2 * 4 * Cout * (Cin + 1)
        + (2 << 20)
    )
    vmem_limit = int(min(max(32 << 20, est_vmem), 56 << 20))

    cost = pl.CostEstimate(
        flops=2 * B * Cout * Cin * P,
        transcendentals=0,
        bytes_accessed=itemsize * B * P * (Cin + Cout) + 4 * B * Cout * (Cin + 1),
    )

    out_shapes = tuple(
        jax.ShapeDtypeStruct((B, ch, P), x_bcp.dtype) for ch in head_ch
    )
    out_specs = tuple(
        pl.BlockSpec((1, ch, tp), out_map) for ch in head_ch
    )

    return pl.pallas_call(
        _fused_head_kernel,
        out_shape=out_shapes,
        grid_spec=pltpu.PrefetchScalarGridSpec(
            num_scalar_prefetch=0,
            grid=grid,
            in_specs=[
                pl.BlockSpec((1, Cout, Cin), wmod_map),
                pl.BlockSpec((Cout, 1), bias_map),
                pl.BlockSpec((1, Cin, tp), x_map),
            ],
            out_specs=out_specs,
        ),
        compiler_params=pltpu.CompilerParams(
            dimension_semantics=("parallel", "parallel"),
            vmem_limit_bytes=vmem_limit,
        ),
        cost_estimate=cost,
    )(w_mod, bias_col, x_bcp)


class HeadPallas:
    """JAX/Pallas equivalent of dusty_v2.Head: ModConv2d(1x1, demod=False) per output."""

    def __init__(self, in_ch, mod_ch, out_ch, key):
        self.in_ch = in_ch
        self.mod_ch = mod_ch
        names, chs = [], []
        conv_w, conv_b, aff_w, aff_b, head_id = [], [], [], [], []
        for h, o in enumerate([o for o in out_ch if o["ch"] > 0]):
            key, k_w, k_aw = jax.random.split(key, 3)
            names.append(o["name"])
            chs.append(o["ch"])
            # ModConv2d weight: (out_ch, in_ch, 1, 1) -> stored as (out_ch, in_ch)
            conv_w.append(jax.random.normal(k_w, (o["ch"], in_ch), jnp.float32))
            conv_b.append(jnp.zeros((o["ch"],), jnp.float32))
            # style affine: EqualLinear(mod_ch -> in_ch), bias init 1.0 (StyleGAN2);
            # the 1/sqrt(mod_ch) equalized-LR multiplier is applied at runtime.
            aff_w.append(jax.random.normal(k_aw, (in_ch, mod_ch), jnp.float32))
            aff_b.append(jnp.ones((in_ch,), jnp.float32))
            head_id.extend([h] * o["ch"])
        self.head_names = names
        self.head_ch = chs
        # Pre-stacked parameters: per-call glue is one einsum + gather + multiply.
        self.conv_w_all = jnp.concatenate(conv_w, axis=0)          # (Cout_total, Cin)
        self.bias_col = jnp.concatenate(conv_b)[:, None]           # (Cout_total, 1)
        self.aff_w_all = jnp.stack(aff_w, axis=0)                  # (nH, Cin, mod_ch)
        self.aff_b_all = jnp.stack(aff_b, axis=0)                  # (nH, Cin)
        self.head_id = jnp.asarray(head_id, jnp.int32)             # (Cout_total,)

    def __call__(self, x_nchw, style):
        B, C, H, W = x_nchw.shape
        P = H * W
        # pixels-last layout: a free reshape of NCHW, no transpose anywhere
        x_bcp = x_nchw.reshape(B, C, P)

        # Glue: batched style affine + weight modulation (tiny B x Cout x Cin math).
        # Folding the style into the weight is exact only because demod=False, ksize=1.
        aff_scale = 1.0 / jnp.sqrt(jnp.float32(self.mod_ch))       # EqualLinear lr mul
        eq = 1.0 / jnp.sqrt(jnp.float32(C))                        # conv equalized-LR scale
        s_all = (
            jnp.einsum("bm,hcm->bhc", style, self.aff_w_all) * aff_scale
            + self.aff_b_all[None]
        )                                                          # (B, nH, Cin)
        s_per_out = jnp.take(s_all, self.head_id, axis=1)          # (B, Cout_total, Cin)
        w_mod = self.conv_w_all[None] * eq * s_per_out             # (B, Cout_total, Cin)

        outs = fused_mod_conv1x1(x_bcp, w_mod, self.bias_col, self.head_ch)
        return {
            name: y.reshape(B, ch, H, W)
            for name, ch, y in zip(self.head_names, self.head_ch, outs)
        }

    def reference(self, x_nchw, style):
        """Pure-JAX reference for correctness checking."""
        out = {}
        off = 0
        aff_scale = 1.0 / math.sqrt(self.mod_ch)
        eq = 1.0 / math.sqrt(self.in_ch)
        for h, (name, ch) in enumerate(zip(self.head_names, self.head_ch)):
            s = style @ (self.aff_w_all[h].T * aff_scale) + self.aff_b_all[h]  # (B, Cin)
            w = self.conv_w_all[off:off + ch]                                  # (Cout_h, Cin)
            b = self.bias_col[off:off + ch, 0]                                 # (Cout_h,)
            w_mod = w[None] * eq * s[:, None, :]                               # (B, Cout_h, Cin)
            y = jnp.einsum("boi,bihw->bohw", w_mod, x_nchw) + b[None, :, None, None]
            out[name] = y
            off += ch
        return out


if __name__ == "__main__":
    key = jax.random.PRNGKey(0)
    k_params, k_x, k_style = jax.random.split(key, 3)

    B, Cin, H, W = 2, 4, 16, 16
    mod_ch = 8
    out_ch = [
        {"name": "depth", "ch": 1},
        {"name": "mask", "ch": 1},
        {"name": "unused", "ch": 0},  # skipped, like the PyTorch module
    ]

    head = HeadPallas(Cin, mod_ch, out_ch, k_params)

    x = jax.random.normal(k_x, (B, Cin, H, W), jnp.float32)
    style = jax.random.normal(k_style, (B, mod_ch), jnp.float32)

    result = head(x, style)
    result = jax.tree_util.tree_map(jax.block_until_ready, result)

    ref = head.reference(x, style)
    for name in result:
        assert result[name].shape == ref[name].shape, name
        err = jnp.max(jnp.abs(result[name] - ref[name]))
        assert err < 1e-4, (name, float(err))

    print("KERNEL_OK")
</pallas_src>

<mosaic_0001>
module attributes {stable_mosaic.version = 11 : i64} {
  func.func @_fused_head_kernel(%arg0: i32, %arg1: i32, %arg2: memref<1x2x4xf32, #tpu.memory_space<vmem>>, %arg3: memref<2x1xf32, #tpu.memory_space<vmem>>, %arg4: memref<1x4x256xf32, #tpu.memory_space<vmem>>, %arg5: memref<1x1x256xf32, #tpu.memory_space<vmem>>, %arg6: memref<1x1x256xf32, #tpu.memory_space<vmem>>) attributes {dimension_semantics = [#tpu.dimension_semantics<parallel>, #tpu.dimension_semantics<parallel>], iteration_bounds = array<i64: 2, 1>, scalar_prefetch = 0 : i64, scratch_operands = 0 : i64, tpu.core_type = #tpu.core_type<tc>, window_params = [{transform_indices = @transform_0, window_bounds = array<i64: 1, 2, 4>}, {pipeline_mode = #tpu.pipeline_mode<synchronous>, transform_indices = @transform_1, window_bounds = array<i64: 2, 1>}, {transform_indices = @transform_2, window_bounds = array<i64: 1, 4, 256>}, {transform_indices = @transform_3, window_bounds = array<i64: 1, 1, 256>}, {transform_indices = @transform_4, window_bounds = array<i64: 1, 1, 256>}]} {
    %c0 = arith.constant 0 : index
    %c0_0 = arith.constant 0 : index
    %c0_1 = arith.constant 0 : index
    %0 = vector.load %arg2[%c0, %c0_0, %c0_1] : memref<1x2x4xf32, #tpu.memory_space<vmem>>, vector<1x2x4xf32>
    %1 = vector.shape_cast %0 : vector<1x2x4xf32> to vector<2x4xf32>
    %c0_2 = arith.constant 0 : index
    %c0_3 = arith.constant 0 : index
    %c0_4 = arith.constant 0 : index
    %2 = vector.load %arg4[%c0_2, %c0_3, %c0_4] : memref<1x4x256xf32, #tpu.memory_space<vmem>>, vector<1x4x256xf32>
    %3 = vector.shape_cast %2 : vector<1x4x256xf32> to vector<4x256xf32>
    %cst = arith.constant dense<0.000000e+00> : vector<2x256xf32>
    %4 = tpu.matmul %1, %3, %cst {dimension_numbers = #tpu.dot_dimension_numbers<[1], [0], [0], [1], [0, 0, 1, 1], [], []>} : vector<2x4xf32>, vector<4x256xf32>, vector<2x256xf32> -> vector<2x256xf32>
    %c0_5 = arith.constant 0 : index
    %c0_6 = arith.constant 0 : index
    %5 = vector.load %arg3[%c0_5, %c0_6] : memref<2x1xf32, #tpu.memory_space<vmem>>, vector<2x1xf32>
    %6 = vector.broadcast %5 : vector<2x1xf32> to vector<2x256xf32>
    %7 = arith.addf %4, %6 : vector<2x256xf32>
    %8 = vector.extract_strided_slice %7 {offsets = [0, 0], sizes = [1, 256], strides = [1, 1]} : vector<2x256xf32> to vector<1x256xf32>
    %c0_7 = arith.constant 0 : index
    %c0_8 = arith.constant 0 : index
    %c0_9 = arith.constant 0 : index
    %9 = vector.load %arg5[%c0_7, %c0_8, %c0_9] : memref<1x1x256xf32, #tpu.memory_space<vmem>>, vector<1x1x256xf32>
    %10 = vector.shape_cast %9 : vector<1x1x256xf32> to vector<1x256xf32>
    %11 = vector.shape_cast %8 : vector<1x256xf32> to vector<1x1x256xf32>
    tpu.vector_store %arg5[%c0_7, %c0_8, %c0_9], %11 {strides = array<i32>} : memref<1x1x256xf32, #tpu.memory_space<vmem>>, vector<1x1x256xf32>,
    %12 = vector.extract_strided_slice %7 {offsets = [1, 0], sizes = [1, 256], strides = [1, 1]} : vector<2x256xf32> to vector<1x256xf32>
    %c0_10 = arith.constant 0 : index
    %c0_11 = arith.constant 0 : index
    %c0_12 = arith.constant 0 : index
    %13 = vector.load %arg6[%c0_10, %c0_11, %c0_12] : memref<1x1x256xf32, #tpu.memory_space<vmem>>, vector<1x1x256xf32>
    %14 = vector.shape_cast %13 : vector<1x1x256xf32> to vector<1x256xf32>
    %15 = vector.shape_cast %12 : vector<1x256xf32> to vector<1x1x256xf32>
    tpu.vector_store %arg6[%c0_10, %c0_11, %c0_12], %15 {strides = array<i32>} : memref<1x1x256xf32, #tpu.memory_space<vmem>>, vector<1x1x256xf32>,
    return
  }
  func.func @transform_0(%arg0: i32, %arg1: i32) -> (i32, i32, i32) {
    %c0_i32 = arith.constant 0 : i32
    %c0_i32_0 = arith.constant 0 : i32
    %c0_i32_1 = arith.constant 0 : i32
    return %arg0, %c0_i32, %c0_i32_0 : i32, i32, i32
  }
  func.func @transform_1(%arg0: i32, %arg1: i32) -> (i32, i32) {
    %c0_i32 = arith.constant 0 : i32
    %c0_i32_0 = arith.constant 0 : i32
    %c0_i32_1 = arith.constant 0 : i32
    return %c0_i32, %c0_i32_0 : i32, i32
  }
  func.func @transform_2(%arg0: i32, %arg1: i32) -> (i32, i32, i32) {
    %c0_i32 = arith.constant 0 : i32
    %c0_i32_0 = arith.constant 0 : i32
    return %arg0, %c0_i32, %arg1 : i32, i32, i32
  }
  func.func @transform_3(%arg0: i32, %arg1: i32) -> (i32, i32, i32) {
    %c0_i32 = arith.constant 0 : i32
    %c0_i32_0 = arith.constant 0 : i32
    return %arg0, %c0_i32, %arg1 : i32, i32, i32
  }
  func.func @transform_4(%arg0: i32, %arg1: i32) -> (i32, i32, i32) {
    %c0_i32 = arith.constant 0 : i32
    %c0_i32_0 = arith.constant 0 : i32
    return %arg0, %c0_i32, %arg1 : i32, i32, i32
  }
}

</mosaic_0001>

<bundles_post_ra>
// kernel: tpu_custom_call.1
= control target key start
LH: loop header
LB: loop body
LE: loop exit
PB: predicated region body
PF: predicated region fallthrough
CT: control target
= control target key end

     0   :  { %10 = vsyncpa [#allocation3], 0  ;;  %s1121_s0 = inlined_call_operand.hbm [shape: f32[2,2,4], index: 0, kind: input, shape index: {}]   ;;  %s1122_s1 = inlined_call_operand.vmem [shape: f32[2,1], index: 1, kind: input, shape index: {}]   ;;  %s1123_s2 = inlined_call_operand.hbm [shape: f32[2,4,256], index: 2, kind: input, shape index: {}]   ;;  %s1124_s3 = inlined_call_operand.hbm [shape: f32[2,1,256], index: 3, kind: output, shape index: {0}]   ;;  %s1125_s4 = inlined_call_operand.hbm [shape: f32[2,1,256], index: 4, kind: output, shape index: {1}]  }
   0x1   :  { %12 = vsyncpa [#allocation3 + $0x1], 0 }
   0x2   :  { %13 = vsyncpa [#allocation6], 0 }
   0x3   :  { %15 = vsyncpa [#allocation6 + $0x1], 0 }
   0x4   :  { %16 = vsyncpa [#allocation4], 0 }
   0x5   :  { %18 = vsyncpa [#allocation4 + $0x1], 0 }
   0x6   :  { %19 = vsyncpa [#allocation9], 0 }
   0x7   :  { %21 = vsyncpa [#allocation9 + $0x1], 0  ;;  %s897_s15 = smov 0   ;;  %s899_s16 = smov 0  }
   0x8   :  { %s901_s17 = smov 0   ;;  %s903_s18 = smov 0  }
   0x9   :  { %s905_s19 = smov 0   ;;  %s907_s20 = smov 0  }
   0xa LB: > { %s588_s21 = sadd.s32 4294967295, %s863_s20   ;;  %s589_s22 = sadd.s32 4294967294, %s863_s20   ;;  %s863_s20 = sphi %s907_s20, %s27_s20   ;;  %s859_s19 = sphi %s905_s19, %s1139_s19   ;;  %s855_s18 = sphi %s903_s18, %s1138_s18   ;;  %s851_s17 = sphi %s901_s17, %s1137_s17   ;;  %s847_s16 = sphi %s899_s16, %s1136_s16   ;;  %s843_s15 = sphi %s897_s15, %s1135_s15  }
   0xb   : > { %s39_s23 = sadd.s32 1, %s859_s19  ;;  %s46_s24 = sadd.s32 1, %s851_s17 }
   0xc   : > { %p41_p0 = scmp.ge.s32.totalorder %s39_s23, 2  ;;  %p53_p1 = scmp.ne.s32.totalorder %s851_s17, %s847_s16 }
   0xd   : > { %p54_p2 = scmp.eq.s32.totalorder %s863_s20, 0  ;;  %p59_p3 = scmp.ne.s32.totalorder %s847_s16, %s843_s15 }
   0xe   : > { %s1141_s23 = smov (%p41_p0, %s39_s23), 0  ;;  %p60_p5 = scmp.eq.s32.totalorder %s588_s21, 0 }
   0xf   : > { %p938_p4 = por %p54_p2, %p53_p1  ;;  %s43_s26 = ssub.s32 %s859_s19, %s1141_s23 }
  0x10   : > { %p134_p6 = scmp.eq.s32.totalorder %s588_s21, 1  ;;  %p44_p7 = scmp.eq.s32.totalorder %s43_s26, 0 }
  0x11   : > { %p944_p8 = por %p60_p5, %p59_p3  ;;  %p140_p10 = scmp.eq.s32.totalorder %s589_s22, 1 }
  0x12   : > { %p948_p9 = por %p134_p6, %p53_p1  ;;  %p638_p13 = scmp.lt.s32.totalorder %s863_s20, 2 }
  0x13   : > { %s953_s29 = scalar_select %p44_p7, %s851_s17, %s46_s24  }
  0x14   : > { %p955_p11 = por %p140_p10, %p59_p3  ;;  %s962_s5 = sand.u32 1, %s851_s17  }
  0x15   : > { %s592_s6 = sshll.u32 %s962_s5, 1  ;;  %s593_s7 = sshll.u32 %s859_s19, 5 }
  0x16   : > { %s200_s10 = scalar_lea.hbm %s1121_s0, %s593_s7  ;;  %s195_s11 = scalar_lea.vmem [#allocation2], %s592_s6 }
  0x17   : > { %s202_s12 = sshll.u32 %s195_s11, 4  ;;  %p971_p0 = pnand %p638_p13, %p938_p4  ;;  %s203_s12 = int_to_ptr.vmem [resolvable:$true] %s202_s12 }
  0x18   : > { %p597_p1 = scmp.ge.s32.totalorder %s863_s20, 1  ;;  %p228_p2 = scmp.lt.s32.totalorder %s863_s20, 3 }
  0x19   : > { %s192_s14 = scalar_lea.sflag [#allocation3], %s962_s5  ;;  %p695_p3 = pneg %p971_p0 }
  0x1a   : > { %s706_s21 = scalar_lea.vmem %s203_s12, 32  ;;  %s865_s22 = smov [#allocation2]  }
  0x1b   : > { %p707_p5 = scmp.ne.s32.totalorder %s203_s12, %s706_s21  ;;  %s711_s24 = sshll.u32 %s865_s22, 4  ;;  %s712_s24 = int_to_ptr.vmem [resolvable:$false] %s711_s24 }
  0x1c   : > { %s713_s25 = scalar_lea.vmem %s712_s24, 64  ;;  %p714_p4 = scmp.lt.s32.totalorder %s203_s12, %s712_s24 }
  0x1d   : > { %p709_p6 = pnand %p707_p5, %p695_p3  ;;  %p715_p10 = scmp.lt.s32.totalorder %s713_s25, %s706_s21 }
  0x1f   : > { %p710_p7 = pneg %p709_p6  ;;  %p716_p13 = por %p715_p10, %p714_p4 }
  0x21   : > { %p717_p12 = pnand %p716_p13, %p710_p7 }
  0x23   : > { %720 = shalt.err (!%p717_p12)
}
  0x24   : > { %627 = dma.hbm_to_vmem [thread:$0]  (!%p971_p0), %s200_s10, 32, %s203_s12, %s192_s14  }
  0x25   : > { %p989_p5 = pnand %p597_p1, %p228_p2  ;;  %s594_s6 = sshll.u32 %s962_s5, 3 }
  0x26   : > { %s613_s7 = sshll.u32 %s859_s19, 7  ;;  %s213_s21 = scalar_lea.vmem [#allocation5], %s594_s6 }
  0x27   : > { %s221_s11 = scalar_lea.hbm %s1123_s2, %s613_s7  ;;  %s223_s22 = sshll.u32 %s213_s21, 4  ;;  %s224_s22 = int_to_ptr.vmem [resolvable:$true] %s223_s22 }
  0x28   : > { %s210_s24 = scalar_lea.sflag [#allocation6], %s962_s5  ;;  %s734_s25 = scalar_lea.vmem %s224_s22, 128 }
  0x29   : > { %p735_p12 = scmp.ne.s32.totalorder %s224_s22, %s734_s25  ;;  %s866_s10 = smov [#allocation5]  }
  0x2a   : > { %s739_s12 = sshll.u32 %s866_s10, 4  ;;  %s740_s12 = int_to_ptr.vmem [resolvable:$false] %s739_s12 }
  0x2b   : > { %p737_p6 = pnand %p735_p12, %p695_p3  ;;  %s741_s14 = scalar_lea.vmem %s740_s12, 256 }
  0x2c   : > { %p742_p1 = scmp.lt.s32.totalorder %s224_s22, %s740_s12  ;;  %p743_p2 = scmp.lt.s32.totalorder %s741_s14, %s734_s25 }
  0x2d   : > { %p738_p7 = pneg %p737_p6 }
  0x2e   : > { %p744_p4 = por %p743_p2, %p742_p1 }
  0x30   : > { %p745_p10 = pnand %p744_p4, %p738_p7 }
  0x32   : > { %748 = shalt.err (!%p745_p10)
}
  0x33   : > { %630 = dma.hbm_to_vmem [thread:$0]  (!%p971_p0), %s221_s11, 128, %s224_s22, %s210_s24  }
  0x34   : > { %232 = sbr.rel (%p989_p5) target bundleno = 304 (0x130), region = 32  ;;  %s1007_s5 = sand.u32 (!%p989_p5), 1, %s847_s16  }
  0x35   : > { %s1010_s6 = sshll.u32 (!%p989_p5), %s1007_s5, 1  ;;  %s235_s7 = scalar_lea.sflag (!%p989_p5), [#allocation3], %s1007_s5 }
  0x36   : > { %s238_s8 = scalar_lea.vmem (!%p989_p5), [#allocation2], %s1010_s6 }
  0x39   : > { %826 = dma.done.wait (%p944_p8), %s235_s7, 32  }
  0x3a   : > { %828 = vsyncadd (%p944_p8), %s235_s7, 4294967264  ;;  %s599_s13 = sshll.u32 %s1007_s5, 3  ;;  %s244_s26 = scalar_lea.sflag [#allocation6], %s1007_s5 }
  0x3b   : > { %s247_s9 = scalar_lea.vmem [#allocation5], %s599_s13 }
  0x3c   : > { %830 = dma.done.wait (%p944_p8), %s244_s26, 128  }
  0x3d   : > { %832 = vsyncadd (%p944_p8), %s244_s26, 4294967168  ;;  %v867_v0 = vmov 0.0   ;;  %v868_v1 = vmov 0   ;;  %v286_v2 = vld [vmem:[%s247_s9] sm:$0xff]  ;;  %vm299_vm0 = vcmask 1043456   ;;  %vm295_vm1 = vcmask 31744  }
  0x3e   : > { %368 = vmatprep.mubr.f32.mxu0 %v867_v0  ;;  %691 = vset.pattern.permute.xlu0 %v868_v1  ;;  %v287_v3 = vld [vmem:[%s1122_s1] sm:$0x3]  ;;  %v294_v4 = vcombine.high %v286_v2, %v286_v2  ;;  %v869_v6 = vmov 1966171168   ;;  %v381_v8 = vlaneseq  ;;  %s614_s27 = sshll.u32 %s855_s18, 5  ;;  %s274_s22 = scalar_lea.vmem [#allocation7], %s1010_s6 }
  0x3f   : > { %290 = vperm.xlu0 %691, %v287_v3   ;;  %v285_v5 = vld [vmem:[%s238_s8] sm:$0x3]  ;;  %v379_v7 = vunpack.c.l.s4 %v869_v6  ;;  %s430_s24 = sshll.u32 %s274_s22, 4  ;;  %s281_s25 = scalar_lea.vmem [#allocation8], %s1010_s6  ;;  %s1041_s24 = int_to_ptr.vmem [resolvable:$true] %s430_s24 }
  0x40   : > { %602 = vmatprep.subr.msk.mxu0 %vm299_vm0, %v294_v4  ;;  %v382_v10 = vshrl.u32 %v381_v8, 7  ;;  %vm1029_vm2 = vcmp.lt.s32.totalorder %v381_v8, 256  ;;  %s446_s10 = sshll.u32 %s281_s25, 4  ;;  %s1039_s7 = scalar_lea.hbm %s1124_s3, %s614_s27  ;;  %s1050_s10 = int_to_ptr.vmem [resolvable:$true] %s446_s10 }
  0x41   : > { %603 = vmatpush1.msk.msra.mxu0 %vm299_vm0, %v286_v2  ;;  %v380_v9 = vunpack.c.0.s8 %v379_v7  ;;  %s1048_s13 = scalar_lea.hbm %s1125_s4, %s614_s27  ;;  %s409_s26 = scalar_lea.sflag [#allocation4], %s1007_s5 }
  0x42   : > { %604 = vmatmul.mubr.msk.f32.vlgmr.msra.gmra.mxu0 %vm295_vm1, %v285_v5  ;;  %s749_s9 = scalar_lea.vmem %s1041_s24, 32  ;;  %s870_s11 = smov [#allocation7]  }
  0x43   : > { %v383_v16 = vsub.s32 %v380_v9, %v382_v10  ;;  %p750_p8 = scmp.ne.s32.totalorder %s1041_s24, %s749_s9  ;;  %s753_s21 = sshll.u32 %s870_s11, 4  ;;  %s754_s21 = int_to_ptr.vmem [resolvable:$false] %s753_s21 }
  0x44   : > { %s755_s12 = scalar_lea.vmem %s754_s21, 64  ;;  %p756_p13 = scmp.lt.s32.totalorder %s1041_s24, %s754_s21 }
  0x45   : > { %p751_p0 = pnand %p750_p8, %p948_p9  ;;  %p757_p5 = scmp.lt.s32.totalorder %s755_s12, %s749_s9 }
  0x47   : > { %p752_p3 = pneg %p751_p0  ;;  %p758_p12 = por %p757_p5, %p756_p13 }
  0x49   : > { %p759_p6 = pnand %p758_p12, %p752_p3 }
  0xba   : > { %v291_v11 = vpop.permute.xlu0 %290 }
 0x102   : > { %v370_v12 = vpop.f32.mrf.mxu0 }
 0x103   : > { %v371_v14 = vadd.f32 %v370_v12, %v291_v11 }
 0x104   : > { %v372_v13 = vpop.f32.mrf.mxu0 }
 0x105   : > { %v373_v15 = vadd.f32 %v372_v13, %v291_v11 }
 0x107   : > { %v377_v17 = vcombine.low %v371_v14, %v373_v15 }
 0x109   : > { %v384_v18 = vrot.slane %v377_v17, %v383_v16 }
 0x10b   : > { %v391_v20 = vrot.slane %v384_v18, %v383_v16  ;;  %v398_v21 = vcombine.high %v384_v18, %v384_v18 }
 0x10d   : > { %v405_v22 = vrot.slane %v398_v21, %v383_v16  ;;  %397 = vst.msk [vmem:[%s274_s22] sm:$0x3] %vm1029_vm2, %v391_v20 }
 0x10e   : > { %762 = shalt.err (!%p759_p6)
}
 0x10f   : > { %s763_s27 = scalar_lea.hbm %s1039_s7, 32  ;;  %s767_s18 = scalar_lea.hbm %s1124_s3, 64 }
 0x110   : > { %p764_p7 = scmp.ne.s32.totalorder %s1039_s7, %s763_s27  ;;  %p768_p4 = scmp.lt.s32.totalorder %s1039_s7, %s1124_s3 }
 0x111   : > { %p769_p10 = scmp.lt.s32.totalorder %s767_s18, %s763_s27 }
 0x112   : > { %p765_p1 = pnand %p764_p7, %p948_p9 }
 0x113   : > { %p770_p8 = por %p769_p10, %p768_p4 }
 0x114   : > { %p766_p2 = pneg %p765_p1 }
 0x116   : > { %p771_p0 = pnand %p770_p8, %p766_p2 }
 0x118   : > { %774 = shalt.err (!%p771_p0)
}
 0x119   : > { %620 = dma.vmem_to_hbm [thread:$0]  (%p948_p9), %s1041_s24, 32, %s1039_s7, %s409_s26   ;;  %407 = vst.msk [vmem:[%s281_s25] sm:$0x3] %vm1029_vm2, %v405_v22 }
 0x11a   : > { %s414_s9 = scalar_lea.sflag [#allocation9], %s1007_s5  ;;  %s775_s21 = scalar_lea.vmem %s1050_s10, 32 }
 0x11b   : > { %p776_p3 = scmp.ne.s32.totalorder %s1050_s10, %s775_s21  ;;  %s871_s12 = smov [#allocation8]  }
 0x11c   : > { %s779_s27 = sshll.u32 %s871_s12, 4  ;;  %s780_s27 = int_to_ptr.vmem [resolvable:$false] %s779_s27 }
 0x11d   : > { %p777_p13 = pnand %p776_p3, %p948_p9  ;;  %s781_s22 = scalar_lea.vmem %s780_s27, 64 }
 0x11e   : > { %p782_p12 = scmp.lt.s32.totalorder %s1050_s10, %s780_s27  ;;  %p783_p6 = scmp.lt.s32.totalorder %s781_s22, %s775_s21 }
 0x11f   : > { %p778_p5 = pneg %p777_p13 }
 0x120   : > { %p784_p7 = por %p783_p6, %p782_p12 }
 0x122   : > { %p785_p1 = pnand %p784_p7, %p778_p5 }
 0x124   : > { %788 = shalt.err (!%p785_p1)
}
 0x125   : > { %s789_s6 = scalar_lea.hbm %s1048_s13, 32  ;;  %s793_s25 = scalar_lea.hbm %s1125_s4, 64 }
 0x126   : > { %p790_p2 = scmp.ne.s32.totalorder %s1048_s13, %s789_s6  ;;  %p794_p8 = scmp.lt.s32.totalorder %s1048_s13, %s1125_s4 }
 0x127   : > { %p795_p0 = scmp.lt.s32.totalorder %s793_s25, %s789_s6 }
 0x128   : > { %p791_p4 = pnand %p790_p2, %p948_p9 }
 0x129   : > { %p796_p3 = por %p795_p0, %p794_p8 }
 0x12a   : > { %p792_p10 = pneg %p791_p4 }
 0x12c   : > { %p797_p13 = pnand %p796_p3, %p792_p10 }
 0x12e   : > { %800 = shalt.err (!%p797_p13)
}
 0x12f   : > { %621 = dma.vmem_to_hbm [thread:$0]  (%p948_p9), %s1050_s10, 32, %s1048_s13, %s414_s9  }
 0x130 PF: > { %s458_s14 = sand.u32 1, %s843_s15   ;;  %p1134_p5 = scmp.ge.s32.totalorder %s863_s20, 2 }
 0x131   : > { %s459_s18 = scalar_lea.sflag [#allocation4], %s458_s14 }
 0x132   : > { %p632_p12 = pnand %p1134_p5, %p955_p11 }
 0x134   : > { %p633_p6 = pneg %p632_p12 }
 0x136   : > { %834 = dma.done.wait (%p633_p6), %s459_s18, 32  }
 0x137   : > { %836 = vsyncadd (%p633_p6), %s459_s18, 4294967264  ;;  %s468_s8 = scalar_lea.sflag [#allocation9], %s458_s14 }
 0x138   : > { %838 = dma.done.wait (%p633_p6), %s468_s8, 32  }
 0x139   : > { %840 = vsyncadd (%p633_p6), %s468_s8, 4294967264  ;;  %s27_s20 = sadd.s32 1, %s863_s20   ;;  %s1135_s15 = smov %s847_s16 }
 0x13a   : > { %p24_p7 = scmp.ge.s32.totalorder %s27_s20, 4   ;;  %s1136_s16 = smov %s851_s17 }
 0x13b   : > { %s1137_s17 = smov %s953_s29  ;;  %s1138_s18 = smov %s859_s19 }
 0x13c   : > { %s1139_s19 = smov %s1141_s23  ;;  %26 = sbr.rel (!%p24_p7) target bundleno = 10 (0xa), region = 107 }
 0x141   :  { %473 = vsyncpa [#allocation3], 1 }
 0x142   :  { %475 = vsyncpa [#allocation3 + $0x1], 1 }
 0x143   :  { %476 = vsyncpa [#allocation6], 1 }
 0x144   :  { %478 = vsyncpa [#allocation6 + $0x1], 1 }
 0x145   :  { %479 = vsyncpa [#allocation4], 1 }
 0x146   :  { %481 = vsyncpa [#allocation4 + $0x1], 1 }
 0x147   :  { %482 = vsyncpa [#allocation9], 1 }
 0x148   :  { %484 = vsyncpa [#allocation9 + $0x1], 1 }

</bundles_post_ra>
